<compile_context>
chip_gen: v5e
topology: v5e:2x2
jax: 0.10.0
libtpu: 0.0.40
codegen_flags: <defaults>
</compile_context>

<pallas_src>
import functools

import numpy as np
import jax
import jax.numpy as jnp
from jax import lax
from jax.experimental import pallas as pl
from jax.experimental.pallas import tpu as pltpu

EPS = 1e-5
LANE = 128
VMEM_LIMIT = 48 * 1024 * 1024          # <= v7x 64 MiB/TC; raise on v5e/v6e if needed


def _round_up(a, b):
    return (a + b - 1) // b * b


def _choose_tile(p, cap=1024):
    """Pick a pixel tile: largest multiple-of-8 divisor of p (<= cap) so no
    padding is needed; otherwise fall back to minimal round-up padding."""
    hi = min(cap, _round_up(p, 8))
    best = 0
    for t in range(8, hi + 1, 8):
        if p % t == 0:
            best = t
    if best >= min(p, 256):
        return best, p
    ntiles = -(-p // cap)
    t = _round_up(-(-p // ntiles), 8)
    return t, t * ntiles


# ---------------------------------------------------------------------------
# Kernel A: conv1 (1x1) as a pixel-tiled channel matmul + bn1 sum/sumsq stats.
# Grid = (G, tiles_per_group): outer axis "parallel" (v7x megacore) owns its
# own (g, 2, C) stats slot; inner axis "arbitrary".  Stats accumulate in VMEM
# scratch and are written once at the last inner step.
# ---------------------------------------------------------------------------
def _conv1x1_stats_kernel(x_ref, w_ref, y_ref, stats_ref, sum_ref, sq_ref):
    t = pl.program_id(1)

    @pl.when(t == 0)
    def _():
        sum_ref[...] = jnp.zeros_like(sum_ref)
        sq_ref[...] = jnp.zeros_like(sq_ref)

    y = jnp.dot(x_ref[...], w_ref[...], preferred_element_type=jnp.float32)
    y_ref[...] = y.astype(y_ref.dtype)                   # bf16 intermediate
    sum_ref[...] += jnp.sum(y, axis=0, keepdims=True)    # stats from f32 result
    sq_ref[...] += jnp.sum(y * y, axis=0, keepdims=True)

    @pl.when(t == pl.num_programs(1) - 1)
    def _():
        stats_ref[0:1, :] = sum_ref[...]
        stats_ref[1:2, :] = sq_ref[...]


# ---------------------------------------------------------------------------
# Kernel B: bn1-apply + ReLU + 3x3 stride-S conv2 + bn2 stats.
# Grid = (N,): one full image per step.  The bn1-activated image is written
# into a zero-bordered VMEM scratch (row pitch Wpad, 8-aligned); the 9 stride-S
# taps of every output pixel are gathered with static strided ref slices and
# contracted in ONE [H2*W2, 9*C1p] x [9*C1p, C1p] MXU matmul per image.
# ---------------------------------------------------------------------------
def _conv2_kernel(y1_ref, sc_ref, sh_ref, w2_ref, y2_ref, stats_ref,
                  pad_ref, sum_ref, sq_ref, *, S, H, W, H2, W2, Wpad):
    n = pl.program_id(0)

    @pl.when(n == 0)
    def _():
        pad_ref[...] = jnp.zeros_like(pad_ref)   # zero borders persist forever
        sum_ref[...] = jnp.zeros_like(sum_ref)
        sq_ref[...] = jnp.zeros_like(sq_ref)

    sc = sc_ref[...]
    sh = sh_ref[...]
    # bn1-apply + ReLU, row by row, into the interior of the padded scratch.
    for ih in range(H):
        row = y1_ref[ih].astype(jnp.float32)                    # [W, C1p]
        pad_ref[pl.ds((ih + 1) * Wpad + 1, W), :] = jnp.maximum(row * sc + sh, 0.0)

    # Gather the 9 stride-S taps for every output pixel; single wide matmul.
    rows = []
    for oh in range(H2):
        taps = []
        for kh in range(3):
            for kw in range(3):
                start = (oh * S + kh) * Wpad + kw                # static offset
                taps.append(pad_ref[pl.ds(start, W2, stride=S), :])
        rows.append(jnp.concatenate(taps, axis=1))               # [W2, 9*C1p]
    slab = jnp.concatenate(rows, axis=0).astype(jnp.bfloat16)    # [H2*W2, 9*C1p]
    y2 = jnp.dot(slab, w2_ref[...], preferred_element_type=jnp.float32)
    y2_ref[...] = y2.astype(y2_ref.dtype)                        # bf16 intermediate

    sum_ref[...] += jnp.sum(y2, axis=0, keepdims=True)
    sq_ref[...] += jnp.sum(y2 * y2, axis=0, keepdims=True)

    @pl.when(n == pl.num_programs(0) - 1)
    def _():
        stats_ref[0:1, :] = sum_ref[...]
        stats_ref[1:2, :] = sq_ref[...]


# ---------------------------------------------------------------------------
# Kernel C: bn2-apply + ReLU + conv3 (1x1) + bn3 stats (pixel-tiled, same
# parallel/arbitrary grid layout as kernel A).
# ---------------------------------------------------------------------------
def _bn_conv1x1_stats_kernel(x_ref, sc_ref, sh_ref, w_ref, y_ref, stats_ref,
                             sum_ref, sq_ref, *, tiles_per_grp, tile, valid_rows):
    g = pl.program_id(0)
    t = pl.program_id(1)

    @pl.when(t == 0)
    def _():
        sum_ref[...] = jnp.zeros_like(sum_ref)
        sq_ref[...] = jnp.zeros_like(sq_ref)

    act = jnp.maximum(x_ref[...].astype(jnp.float32) * sc_ref[...] + sh_ref[...], 0.0)
    if valid_rows is not None:   # only generated when the pixel axis is padded
        row0 = (g * tiles_per_grp + t) * tile
        ridx = lax.broadcasted_iota(jnp.int32, (tile, 1), 0) + row0
        act = jnp.where(ridx < valid_rows, act, 0.0)
    # TODO(synk): conv3 bias omitted — exact no-op under the train-mode bn3.
    y = jnp.dot(act.astype(jnp.bfloat16), w_ref[...],
                preferred_element_type=jnp.float32)
    y_ref[...] = y.astype(y_ref.dtype)                   # bf16 intermediate
    sum_ref[...] += jnp.sum(y, axis=0, keepdims=True)
    sq_ref[...] += jnp.sum(y * y, axis=0, keepdims=True)

    @pl.when(t == pl.num_programs(1) - 1)
    def _():
        stats_ref[0:1, :] = sum_ref[...]
        stats_ref[1:2, :] = sq_ref[...]


# ---------------------------------------------------------------------------
# Kernel D: bn3-apply (2x identity residual folded into scale/shift) + ReLU.
# No cross-step accumulation -> the pixel axis is "parallel".
# ---------------------------------------------------------------------------
def _bn_relu_kernel(y_ref, sc_ref, sh_ref, out_ref):
    out_ref[...] = jnp.maximum(
        y_ref[...].astype(jnp.float32) * sc_ref[...] + sh_ref[...], 0.0)


def _bn_scale_shift(stats, gamma, beta, count):
    """stats: [2, C] (sum, sumsq) -> per-channel (scale, shift), each [1, C]."""
    mean = stats[0:1, :] / count
    var = jnp.maximum(stats[1:2, :] / count - mean * mean, 0.0)
    scale = gamma * lax.rsqrt(var + EPS)
    shift = beta - mean * scale
    return scale, shift


def bottleneck_forward(x_nchw, params, *, out_channels):
    N, Cin, H, W = x_nchw.shape
    C1 = out_channels
    Cout = 4 * C1
    S = out_channels                     # conv2 stride, as literally written
    H2 = (H + 2 - 3) // S + 1
    W2 = (W + 2 - 3) // S + 1
    Hpad = H + 2
    Wpad = _round_up(W + 2, 8)           # 8-aligned row pitch for the scratch

    Cin_p = _round_up(Cin, LANE)
    C1p = _round_up(C1, LANE)
    Coutp = _round_up(Cout, LANE)

    # ---- pack / pad parameters (channels padded to the 128-lane width) ------
    w1 = jnp.zeros((Cin_p, C1p), jnp.bfloat16).at[:Cin, :C1].set(
        params['w1'].astype(jnp.bfloat16))
    w2col = jnp.zeros((9 * C1p, C1p), jnp.bfloat16)
    for kh in range(3):
        for kw in range(3):
            base = (kh * 3 + kw) * C1p
            w2col = w2col.at[base:base + C1, :C1].set(
                params['w2'][kh, kw].astype(jnp.bfloat16))
    w3 = jnp.zeros((C1p, Coutp), jnp.bfloat16).at[:C1, :Cout].set(
        params['w3'].astype(jnp.bfloat16))

    def padvec(v, cp):
        return jnp.zeros((1, cp), jnp.float32).at[0, :v.shape[0]].set(
            v.astype(jnp.float32))

    g1, b1 = padvec(params['g1'], C1p), padvec(params['b1'], C1p)
    g2, b2 = padvec(params['g2'], C1p), padvec(params['b2'], C1p)
    g3, b3 = padvec(params['g3'], Coutp), padvec(params['b3'], Coutp)

    # ---- layout glue: NCHW -> channels-last flat pixels, lane-padded --------
    P = N * H * W
    TP, P_pad = _choose_tile(P)
    x_flat = jnp.transpose(x_nchw, (0, 2, 3, 1)).reshape(P, Cin).astype(jnp.bfloat16)
    if P_pad == P and Cin_p == Cin:
        x_p = x_flat
    else:
        x_p = jnp.zeros((P_pad, Cin_p), jnp.bfloat16).at[:P, :Cin].set(x_flat)

    # ---- kernel A: conv1 + bn1 stats ----------------------------------------
    nt1 = P_pad // TP
    G1 = 2 if nt1 % 2 == 0 else 1
    tpg1 = nt1 // G1
    y1_flat, stats1g = pl.pallas_call(
        _conv1x1_stats_kernel,
        grid=(G1, tpg1),
        in_specs=[pl.BlockSpec((TP, Cin_p), lambda g, t: (g * tpg1 + t, 0)),
                  pl.BlockSpec((Cin_p, C1p), lambda g, t: (0, 0))],
        out_specs=[pl.BlockSpec((TP, C1p), lambda g, t: (g * tpg1 + t, 0)),
                   pl.BlockSpec((None, 2, C1p), lambda g, t: (g, 0, 0))],
        out_shape=[jax.ShapeDtypeStruct((P_pad, C1p), jnp.bfloat16),
                   jax.ShapeDtypeStruct((G1, 2, C1p), jnp.float32)],
        scratch_shapes=[pltpu.VMEM((1, C1p), jnp.float32),
                        pltpu.VMEM((1, C1p), jnp.float32)],
        compiler_params=pltpu.CompilerParams(
            dimension_semantics=("parallel", "arbitrary"),
            vmem_limit_bytes=VMEM_LIMIT),
    )(x_p, w1)
    stats1 = jnp.sum(stats1g, axis=0)
    sc1, sh1 = _bn_scale_shift(stats1, g1, b1, float(P))

    # ---- kernel B: bn1-apply + conv2 + bn2 stats (one image per step) -------
    y1_img = (y1_flat if P_pad == P else y1_flat[:P]).reshape(N, H, W, C1p)

    conv2 = functools.partial(_conv2_kernel, S=S, H=H, W=W, H2=H2, W2=W2, Wpad=Wpad)
    y2, stats2 = pl.pallas_call(
        conv2,
        grid=(N,),
        in_specs=[pl.BlockSpec((None, H, W, C1p), lambda n: (n, 0, 0, 0)),
                  pl.BlockSpec((1, C1p), lambda n: (0, 0)),
                  pl.BlockSpec((1, C1p), lambda n: (0, 0)),
                  pl.BlockSpec((9 * C1p, C1p), lambda n: (0, 0))],
        out_specs=[pl.BlockSpec((None, H2 * W2, C1p), lambda n: (n, 0, 0)),
                   pl.BlockSpec((2, C1p), lambda n: (0, 0))],
        out_shape=[jax.ShapeDtypeStruct((N, H2 * W2, C1p), jnp.bfloat16),
                   jax.ShapeDtypeStruct((2, C1p), jnp.float32)],
        scratch_shapes=[pltpu.VMEM((Hpad * Wpad, C1p), jnp.float32),
                        pltpu.VMEM((1, C1p), jnp.float32),
                        pltpu.VMEM((1, C1p), jnp.float32)],
        compiler_params=pltpu.CompilerParams(
            dimension_semantics=("arbitrary",),
            vmem_limit_bytes=VMEM_LIMIT),
    )(y1_img, sc1, sh1, w2col)

    P2 = N * H2 * W2
    sc2, sh2 = _bn_scale_shift(stats2, g2, b2, float(P2))

    # ---- kernel C: bn2-apply + conv3 + bn3 stats ----------------------------
    TP2, P2_pad = _choose_tile(P2)
    y2_flat = y2.reshape(P2, C1p)
    if P2_pad != P2:
        y2_flat = jnp.zeros((P2_pad, C1p), jnp.bfloat16).at[:P2].set(y2_flat)

    nt3 = P2_pad // TP2
    G3 = 2 if nt3 % 2 == 0 else 1
    tpg3 = nt3 // G3
    conv3 = functools.partial(_bn_conv1x1_stats_kernel, tiles_per_grp=tpg3,
                              tile=TP2, valid_rows=(P2 if P2_pad != P2 else None))
    y3_flat, stats3g = pl.pallas_call(
        conv3,
        grid=(G3, tpg3),
        in_specs=[pl.BlockSpec((TP2, C1p), lambda g, t: (g * tpg3 + t, 0)),
                  pl.BlockSpec((1, C1p), lambda g, t: (0, 0)),
                  pl.BlockSpec((1, C1p), lambda g, t: (0, 0)),
                  pl.BlockSpec((C1p, Coutp), lambda g, t: (0, 0))],
        out_specs=[pl.BlockSpec((TP2, Coutp), lambda g, t: (g * tpg3 + t, 0)),
                   pl.BlockSpec((None, 2, Coutp), lambda g, t: (g, 0, 0))],
        out_shape=[jax.ShapeDtypeStruct((P2_pad, Coutp), jnp.bfloat16),
                   jax.ShapeDtypeStruct((G3, 2, Coutp), jnp.float32)],
        scratch_shapes=[pltpu.VMEM((1, Coutp), jnp.float32),
                        pltpu.VMEM((1, Coutp), jnp.float32)],
        compiler_params=pltpu.CompilerParams(
            dimension_semantics=("parallel", "arbitrary"),
            vmem_limit_bytes=VMEM_LIMIT),
    )(y2_flat, sc2, sh2, w3)
    stats3 = jnp.sum(stats3g, axis=0)

    # ---- kernel D: bn3-apply (2x identity residual folded) + ReLU -----------
    sc3, sh3 = _bn_scale_shift(stats3, g3, b3, float(P2))
    sc3 = 2.0 * sc3            # x += shortcut(x) with Identity == 2 * bn3(conv3(.))
    sh3 = 2.0 * sh3

    out_flat = pl.pallas_call(
        _bn_relu_kernel,
        grid=(nt3,),
        in_specs=[pl.BlockSpec((TP2, Coutp), lambda i: (i, 0)),
                  pl.BlockSpec((1, Coutp), lambda i: (0, 0)),
                  pl.BlockSpec((1, Coutp), lambda i: (0, 0))],
        out_specs=pl.BlockSpec((TP2, Coutp), lambda i: (i, 0)),
        out_shape=jax.ShapeDtypeStruct((P2_pad, Coutp), jnp.float32),
        compiler_params=pltpu.CompilerParams(
            dimension_semantics=("parallel",), vmem_limit_bytes=VMEM_LIMIT),
    )(y3_flat, sc3, sh3)

    # Final lane/pixel un-padding + NHWC->NCHW to match the module's layout.
    out = out_flat[:P2, :Cout].reshape(N, H2, W2, Cout)
    return jnp.transpose(out, (0, 3, 1, 2))


def reference_forward(x_nchw, params, *, out_channels):
    """Pure-JAX f32 reference of the same forward semantics (sanity check)."""
    S = out_channels
    x = jnp.transpose(x_nchw, (0, 2, 3, 1))                       # NHWC

    def bn(y, g, b):
        mu = jnp.mean(y, axis=(0, 1, 2), keepdims=True)
        var = jnp.mean((y - mu) ** 2, axis=(0, 1, 2), keepdims=True)
        return (y - mu) / jnp.sqrt(var + EPS) * g.reshape(1, 1, 1, -1) \
            + b.reshape(1, 1, 1, -1)

    y = jnp.einsum('nhwc,cd->nhwd', x, params['w1'])
    y = jax.nn.relu(bn(y, params['g1'], params['b1']))
    y = lax.conv_general_dilated(y, params['w2'], (S, S), ((1, 1), (1, 1)),
                                 dimension_numbers=('NHWC', 'HWIO', 'NHWC'))
    y = jax.nn.relu(bn(y, params['g2'], params['b2']))
    y = jnp.einsum('nhwc,cd->nhwd', y, params['w3']) + params['cb3'].reshape(1, 1, 1, -1)
    y = bn(y, params['g3'], params['b3'])
    y = jax.nn.relu(y + y)
    return jnp.transpose(y, (0, 3, 1, 2))


if __name__ == "__main__":
    # Small, runnable configuration: in_channels == 4 * out_channels, stride=1
    # (the only configuration under which the PyTorch forward can execute).
    N, H, W = 2, 16, 16
    out_channels = 4
    in_channels = 4 * out_channels            # 16
    Cout = 4 * out_channels

    key = jax.random.PRNGKey(0)
    ks = jax.random.split(key, 12)
    params = dict(
        w1=0.2 * jax.random.normal(ks[0], (in_channels, out_channels), jnp.float32),
        g1=1.0 + 0.1 * jax.random.normal(ks[1], (out_channels,), jnp.float32),
        b1=0.1 * jax.random.normal(ks[2], (out_channels,), jnp.float32),
        w2=0.2 * jax.random.normal(ks[3], (3, 3, out_channels, out_channels), jnp.float32),
        g2=1.0 + 0.1 * jax.random.normal(ks[4], (out_channels,), jnp.float32),
        b2=0.1 * jax.random.normal(ks[5], (out_channels,), jnp.float32),
        w3=0.2 * jax.random.normal(ks[6], (out_channels, Cout), jnp.float32),
        cb3=0.1 * jax.random.normal(ks[7], (Cout,), jnp.float32),
        g3=1.0 + 0.1 * jax.random.normal(ks[8], (Cout,), jnp.float32),
        b3=0.1 * jax.random.normal(ks[9], (Cout,), jnp.float32),
    )
    x = jax.random.normal(ks[10], (N, in_channels, H, W), jnp.float32)   # NCHW

    out = jax.block_until_ready(bottleneck_forward(x, params, out_channels=out_channels))
    ref = jax.block_until_ready(reference_forward(x, params, out_channels=out_channels))
    np.testing.assert_allclose(np.asarray(out), np.asarray(ref), rtol=8e-2, atol=8e-2)

    print("KERNEL_OK")
</pallas_src>

<mosaic_0001>
module attributes {stable_mosaic.version = 11 : i64} {
  func.func @_conv1x1_stats_kernel(%arg0: i32, %arg1: i32, %arg2: memref<512x128xbf16, #tpu.memory_space<vmem>>, %arg3: memref<128x128xbf16, #tpu.memory_space<vmem>>, %arg4: memref<512x128xbf16, #tpu.memory_space<vmem>>, %arg5: memref<1x2x128xf32, #tpu.memory_space<vmem>>, %arg6: memref<1x128xf32, #tpu.memory_space<vmem>>, %arg7: memref<1x128xf32, #tpu.memory_space<vmem>>) attributes {dimension_semantics = [#tpu.dimension_semantics<parallel>, #tpu.dimension_semantics<arbitrary>], iteration_bounds = array<i64: 1, 1>, scalar_prefetch = 0 : i64, scratch_operands = 2 : i64, tpu.core_type = #tpu.core_type<tc>, window_params = [{transform_indices = @transform_0, window_bounds = array<i64: 512, 128>}, {pipeline_mode = #tpu.pipeline_mode<synchronous>, transform_indices = @transform_1, window_bounds = array<i64: 128, 128>}, {transform_indices = @transform_2, window_bounds = array<i64: 512, 128>}, {transform_indices = @transform_3, window_bounds = array<i64: 1, 2, 128>}]} {
    %c0_i32 = arith.constant 0 : i32
    %0 = arith.cmpi eq, %arg1, %c0_i32 : i32
    %1 = arith.extui %0 : i1 to i32
    %c0_i32_0 = arith.constant 0 : i32
    %2 = arith.cmpi ne, %1, %c0_i32_0 : i32
    scf.if %2 {
      %cst_18 = arith.constant 0.000000e+00 : f32
      %22 = vector.broadcast %cst_18 : f32 to vector<1x128xf32>
      %c0_19 = arith.constant 0 : index
      %c0_20 = arith.constant 0 : index
      %23 = vector.load %arg6[%c0_19, %c0_20] : memref<1x128xf32, #tpu.memory_space<vmem>>, vector<1x128xf32>
      tpu.vector_store %arg6[%c0_19, %c0_20], %22 {strides = array<i32>} : memref<1x128xf32, #tpu.memory_space<vmem>>, vector<1x128xf32>,
      %cst_21 = arith.constant 0.000000e+00 : f32
      %24 = vector.broadcast %cst_21 : f32 to vector<1x128xf32>
      %c0_22 = arith.constant 0 : index
      %c0_23 = arith.constant 0 : index
      %25 = vector.load %arg7[%c0_22, %c0_23] : memref<1x128xf32, #tpu.memory_space<vmem>>, vector<1x128xf32>
      tpu.vector_store %arg7[%c0_22, %c0_23], %24 {strides = array<i32>} : memref<1x128xf32, #tpu.memory_space<vmem>>, vector<1x128xf32>,
    } else {
    }
    %c0 = arith.constant 0 : index
    %c0_1 = arith.constant 0 : index
    %3 = vector.load %arg2[%c0, %c0_1] : memref<512x128xbf16, #tpu.memory_space<vmem>>, vector<512x128xbf16>
    %c0_2 = arith.constant 0 : index
    %c0_3 = arith.constant 0 : index
    %4 = vector.load %arg3[%c0_2, %c0_3] : memref<128x128xbf16, #tpu.memory_space<vmem>>, vector<128x128xbf16>
    %cst = arith.constant dense<0.000000e+00> : vector<512x128xf32>
    %5 = tpu.matmul %3, %4, %cst {dimension_numbers = #tpu.dot_dimension_numbers<[1], [0], [0], [1], [0, 0, 1, 1], [], []>} : vector<512x128xbf16>, vector<128x128xbf16>, vector<512x128xf32> -> vector<512x128xf32>
    %6 = arith.truncf %5 : vector<512x128xf32> to vector<512x128xbf16>
    %c0_4 = arith.constant 0 : index
    %c0_5 = arith.constant 0 : index
    %7 = vector.load %arg4[%c0_4, %c0_5] : memref<512x128xbf16, #tpu.memory_space<vmem>>, vector<512x128xbf16>
    tpu.vector_store %arg4[%c0_4, %c0_5], %6 {strides = array<i32>} : memref<512x128xbf16, #tpu.memory_space<vmem>>, vector<512x128xbf16>,
    %c0_6 = arith.constant 0 : index
    %c0_7 = arith.constant 0 : index
    %8 = vector.load %arg6[%c0_6, %c0_7] : memref<1x128xf32, #tpu.memory_space<vmem>>, vector<1x128xf32>
    %cst_8 = arith.constant dense<0.000000e+00> : vector<128xf32>
    %9 = vector.multi_reduction <add>, %5, %cst_8 [0] : vector<512x128xf32> to vector<128xf32>
    %10 = vector.shape_cast %9 : vector<128xf32> to vector<1x128xf32>
    %11 = arith.addf %8, %10 : vector<1x128xf32>
    %c0_9 = arith.constant 0 : index
    %c0_10 = arith.constant 0 : index
    %12 = vector.load %arg6[%c0_9, %c0_10] : memref<1x128xf32, #tpu.memory_space<vmem>>, vector<1x128xf32>
    tpu.vector_store %arg6[%c0_9, %c0_10], %11 {strides = array<i32>} : memref<1x128xf32, #tpu.memory_space<vmem>>, vector<1x128xf32>,
    %c0_11 = arith.constant 0 : index
    %c0_12 = arith.constant 0 : index
    %13 = vector.load %arg7[%c0_11, %c0_12] : memref<1x128xf32, #tpu.memory_space<vmem>>, vector<1x128xf32>
    %14 = arith.mulf %5, %5 : vector<512x128xf32>
    %cst_13 = arith.constant dense<0.000000e+00> : vector<128xf32>
    %15 = vector.multi_reduction <add>, %14, %cst_13 [0] : vector<512x128xf32> to vector<128xf32>
    %16 = vector.shape_cast %15 : vector<128xf32> to vector<1x128xf32>
    %17 = arith.addf %13, %16 : vector<1x128xf32>
    %c0_14 = arith.constant 0 : index
    %c0_15 = arith.constant 0 : index
    %18 = vector.load %arg7[%c0_14, %c0_15] : memref<1x128xf32, #tpu.memory_space<vmem>>, vector<1x128xf32>
    tpu.vector_store %arg7[%c0_14, %c0_15], %17 {strides = array<i32>} : memref<1x128xf32, #tpu.memory_space<vmem>>, vector<1x128xf32>,
    %c0_i32_16 = arith.constant 0 : i32
    %19 = arith.cmpi eq, %arg1, %c0_i32_16 : i32
    %20 = arith.extui %19 : i1 to i32
    %c0_i32_17 = arith.constant 0 : i32
    %21 = arith.cmpi ne, %20, %c0_i32_17 : i32
    scf.if %21 {
      %c0_18 = arith.constant 0 : index
      %c0_19 = arith.constant 0 : index
      %22 = vector.load %arg6[%c0_18, %c0_19] : memref<1x128xf32, #tpu.memory_space<vmem>>, vector<1x128xf32>
      %c0_20 = arith.constant 0 : index
      %c0_21 = arith.constant 0 : index
      %c0_22 = arith.constant 0 : index
      %23 = vector.load %arg5[%c0_20, %c0_21, %c0_22] : memref<1x2x128xf32, #tpu.memory_space<vmem>>, vector<1x1x128xf32>
      %24 = vector.shape_cast %23 : vector<1x1x128xf32> to vector<1x128xf32>
      %25 = vector.shape_cast %22 : vector<1x128xf32> to vector<1x1x128xf32>
      tpu.vector_store %arg5[%c0_20, %c0_21, %c0_22], %25 {strides = array<i32>} : memref<1x2x128xf32, #tpu.memory_space<vmem>>, vector<1x1x128xf32>,
      %c0_23 = arith.constant 0 : index
      %c0_24 = arith.constant 0 : index
      %26 = vector.load %arg7[%c0_23, %c0_24] : memref<1x128xf32, #tpu.memory_space<vmem>>, vector<1x128xf32>
      %c0_25 = arith.constant 0 : index
      %c1 = arith.constant 1 : index
      %c0_26 = arith.constant 0 : index
      %27 = vector.load %arg5[%c0_25, %c1, %c0_26] : memref<1x2x128xf32, #tpu.memory_space<vmem>>, vector<1x1x128xf32>
      %28 = vector.shape_cast %27 : vector<1x1x128xf32> to vector<1x128xf32>
      %29 = vector.shape_cast %26 : vector<1x128xf32> to vector<1x1x128xf32>
      tpu.vector_store %arg5[%c0_25, %c1, %c0_26], %29 {strides = array<i32>} : memref<1x2x128xf32, #tpu.memory_space<vmem>>, vector<1x1x128xf32>,
    } else {
    }
    return
  }
  func.func @transform_0(%arg0: i32, %arg1: i32) -> (i32, i32) {
    %c1_i32 = arith.constant 1 : i32
    %0 = arith.muli %arg0, %c1_i32 : i32
    %1 = arith.addi %0, %arg1 : i32
    %c0_i32 = arith.constant 0 : i32
    %c0_i32_0 = arith.constant 0 : i32
    return %1, %c0_i32 : i32, i32
  }
  func.func @transform_1(%arg0: i32, %arg1: i32) -> (i32, i32) {
    %c0_i32 = arith.constant 0 : i32
    %c0_i32_0 = arith.constant 0 : i32
    %c0_i32_1 = arith.constant 0 : i32
    return %c0_i32, %c0_i32_0 : i32, i32
  }
  func.func @transform_2(%arg0: i32, %arg1: i32) -> (i32, i32) {
    %c1_i32 = arith.constant 1 : i32
    %0 = arith.muli %arg0, %c1_i32 : i32
    %1 = arith.addi %0, %arg1 : i32
    %c0_i32 = arith.constant 0 : i32
    %c0_i32_0 = arith.constant 0 : i32
    return %1, %c0_i32 : i32, i32
  }
  func.func @transform_3(%arg0: i32, %arg1: i32) -> (i32, i32, i32) {
    %c0_i32 = arith.constant 0 : i32
    %c0_i32_0 = arith.constant 0 : i32
    %c0_i32_1 = arith.constant 0 : i32
    return %arg0, %c0_i32, %c0_i32_0 : i32, i32, i32
  }
}

</mosaic_0001>

<bundles_post_ra>
// kernel: tpu_custom_call.1
= control target key start
LH: loop header
LB: loop body
LE: loop exit
PB: predicated region body
PF: predicated region fallthrough
CT: control target
= control target key end

     0   :  { %9 = vsyncpa [#allocation5], 0  ;;  %s1801_s0 = inlined_call_operand.hbm [shape: bf16[512,128], index: 0, kind: input, shape index: {}]   ;;  %s1802_s1 = inlined_call_operand.hbm [shape: bf16[128,128], index: 1, kind: input, shape index: {}]   ;;  %s1803_s2 = inlined_call_operand.hbm [shape: bf16[512,128], index: 2, kind: output, shape index: {0}]   ;;  %s1804_s3 = inlined_call_operand.hbm [shape: f32[1,2,128], index: 3, kind: output, shape index: {1}]  }
   0x1   :  { %10 = vsyncpa [#allocation8], 0 }
   0x2   :  { %11 = vsyncpa [#allocation6], 0 }
   0x3   :  { %12 = vsyncpa [#allocation11], 0  ;;  %s21_s14 = sshll.u32 %s1801_s0, 4  ;;  %s1459_s15 = smov [#allocation4]   ;;  %s22_s14 = int_to_ptr.hbm [resolvable:$true] %s21_s14 }
   0x4   :  { %s23_s16 = sshll.u32 %s1459_s15, 4  ;;  %s34_s19 = sshll.u32 %s1802_s1, 4  ;;  %s24_s16 = int_to_ptr.vmem [resolvable:$true] %s23_s16  ;;  %s35_s19 = int_to_ptr.hbm [resolvable:$true] %s34_s19 }
   0x5   :  { %s1460_s20 = smov 64   ;;  %s1461_s21 = smov 4  }
   0x6   :  { %29 = dma.hbm_to_vmem [thread:$0]  %s22_s14, 4096, %s24_s16, [#allocation5], %s1460_s20, %s1460_s20, %s1461_s21  }
   0x7   :  { %s1462_s22 = smov [#allocation7]  }
   0x8   :  { %s36_s23 = sshll.u32 %s1462_s22, 4  ;;  %s37_s23 = int_to_ptr.vmem [resolvable:$true] %s36_s23 }
   0x9   :  { %42 = dma.hbm_to_vmem [thread:$0]  %s35_s19, 1024, %s37_s23, [#allocation8], %s1460_s20, %s1460_s20, %s1461_s21  }
   0xa   :  { %1451 = dma.done.wait [#allocation5], 4096  }
   0xb   :  { %1452 = vsyncadd [#allocation5], 4294963200 }
   0xc   :  { %1453 = dma.done.wait [#allocation8], 1024  }
   0xd   :  { %1454 = vsyncadd [#allocation8], 4294966272  ;;  %v1132_v0 = vld [vmem:[#allocation7 + $0x38] sm:$0xff]  ;;  %v1131_v1 = vld [vmem:[#allocation7 + $0x30] sm:$0xff]  ;;  %s1463_s0 = smov [#allocation9]   ;;  %s903_s26 = sshll.u32 %s1803_s2, 4  ;;  %s904_s26 = int_to_ptr.hbm [resolvable:$true] %s903_s26 }
   0xe   :  { %381 = vmatpush.bf16.msra.mxu0 %v1132_v0  ;;  %1324 = vmatpush.bf16.msra.mxu1 %v1132_v0  ;;  %v1130_v2 = vld [vmem:[#allocation7 + $0x28] sm:$0xff]  ;;  %v1129_v3 = vld [vmem:[#allocation7 + $0x20] sm:$0xff]  ;;  %v1128_v4 = vld [vmem:[#allocation7 + $0x18] sm:$0xff]  ;;  %s901_s1 = sshll.u32 %s1463_s0, 4  ;;  %s1465_s2 = smov [#allocation10]   ;;  %s902_s1 = int_to_ptr.vmem [resolvable:$true] %s901_s1 }
   0xf   :  { %1325 = vmatpush.bf16.msra.mxu2 %v1132_v0  ;;  %1326 = vmatpush.bf16.msra.mxu3 %v1132_v0  ;;  %v1127_v5 = vld [vmem:[#allocation7 + $0x10] sm:$0xff]  ;;  %v1126_v6 = vld [vmem:[#allocation7 + $0x8] sm:$0xff]  ;;  %v1125_v7 = vld [vmem:[#allocation7] sm:$0xff]  ;;  %s915_s27 = sshll.u32 %s1465_s2, 4  ;;  %s917_s30 = sshll.u32 %s1804_s3, 4  ;;  %s916_s27 = int_to_ptr.vmem [resolvable:$true] %s915_s27  ;;  %s918_s30 = int_to_ptr.hbm [resolvable:$true] %s917_s30 }
  0x10   :  { %v1093_v8 = vld [vmem:[#allocation4] sm:$0xff]  ;;  %v1094_v10 = vld [vmem:[#allocation4 + $0x8] sm:$0xff]  ;;  %v1095_v13 = vld [vmem:[#allocation4 + $0x10] sm:$0xff] }
  0x11   :  { %v1101_v9 = vld [vmem:[#allocation4 + $0x40] sm:$0xff]  ;;  %v1102_v11 = vld [vmem:[#allocation4 + $0x48] sm:$0xff]  ;;  %v1103_v14 = vld [vmem:[#allocation4 + $0x50] sm:$0xff] }
  0x12   :  { %382 = vmatpush.bf16.msra.mxu0 %v1131_v1  ;;  %1327 = vmatpush.bf16.msra.mxu1 %v1131_v1  ;;  %v1109_v12 = vld [vmem:[#allocation4 + $0x80] sm:$0xff]  ;;  %v1110_v15 = vld [vmem:[#allocation4 + $0x88] sm:$0xff]  ;;  %v1096_v16 = vld [vmem:[#allocation4 + $0x18] sm:$0xff] }
  0x13   :  { %1328 = vmatpush.bf16.msra.mxu2 %v1131_v1  ;;  %1329 = vmatpush.bf16.msra.mxu3 %v1131_v1  ;;  %v1104_v17 = vld [vmem:[#allocation4 + $0x58] sm:$0xff]  ;;  %v1111_v18 = vld [vmem:[#allocation4 + $0x90] sm:$0xff]  ;;  %v1117_v19 = vld [vmem:[#allocation4 + $0xc0] sm:$0xff] }
  0x14   :  { %v1097_v20 = vld [vmem:[#allocation4 + $0x20] sm:$0xff]  ;;  %v1112_v22 = vld [vmem:[#allocation4 + $0x98] sm:$0xff]  ;;  %v1118_v23 = vld [vmem:[#allocation4 + $0xc8] sm:$0xff] }
  0x15   :  { %v1105_v21 = vld [vmem:[#allocation4 + $0x60] sm:$0xff]  ;;  %v1098_v24 = vld [vmem:[#allocation4 + $0x28] sm:$0xff]  ;;  %v1119_v27 = vld [vmem:[#allocation4 + $0xd0] sm:$0xff] }
  0x16   :  { %383 = vmatpush.bf16.msra.mxu0 %v1130_v2  ;;  %1330 = vmatpush.bf16.msra.mxu1 %v1130_v2  ;;  %v1106_v25 = vld [vmem:[#allocation4 + $0x68] sm:$0xff]  ;;  %v1113_v26 = vld [vmem:[#allocation4 + $0xa0] sm:$0xff]  ;;  %v1099_v28 = vld [vmem:[#allocation4 + $0x30] sm:$0xff] }
  0x17   :  { %1331 = vmatpush.bf16.msra.mxu2 %v1130_v2  ;;  %1332 = vmatpush.bf16.msra.mxu3 %v1130_v2  ;;  %v1107_v29 = vld [vmem:[#allocation4 + $0x70] sm:$0xff]  ;;  %v1114_v30 = vld [vmem:[#allocation4 + $0xa8] sm:$0xff]  ;;  %v1120_v31 = vld [vmem:[#allocation4 + $0xd8] sm:$0xff] }
  0x18   :  { %v1100_v32 = vld [vmem:[#allocation4 + $0x38] sm:$0xff]  ;;  %v1115_v34 = vld [vmem:[#allocation4 + $0xb0] sm:$0xff]  ;;  %v1121_v35 = vld [vmem:[#allocation4 + $0xe0] sm:$0xff] }
  0x19   :  { %v1108_v33 = vld [vmem:[#allocation4 + $0x78] sm:$0xff]  ;;  %v1122_v39 = vld [vmem:[#allocation4 + $0xe8] sm:$0xff]  ;;  %v1123_v53 = vld [vmem:[#allocation4 + $0xf0] sm:$0xff] }
  0x1a   :  { %384 = vmatpush.bf16.msra.mxu0 %v1129_v3  ;;  %1333 = vmatpush.bf16.msra.mxu1 %v1129_v3  ;;  %v1116_v38 = vld [vmem:[#allocation4 + $0xb8] sm:$0xff] }
  0x1b   :  { %1334 = vmatpush.bf16.msra.mxu2 %v1129_v3  ;;  %1335 = vmatpush.bf16.msra.mxu3 %v1129_v3 }
  0x1e   :  { %385 = vmatpush.bf16.msra.mxu0 %v1128_v4  ;;  %1336 = vmatpush.bf16.msra.mxu1 %v1128_v4 }
  0x1f   :  { %1337 = vmatpush.bf16.msra.mxu2 %v1128_v4  ;;  %1338 = vmatpush.bf16.msra.mxu3 %v1128_v4 }
  0x22   :  { %386 = vmatpush.bf16.msra.mxu0 %v1127_v5  ;;  %1339 = vmatpush.bf16.msra.mxu1 %v1127_v5 }
  0x23   :  { %1340 = vmatpush.bf16.msra.mxu2 %v1127_v5  ;;  %1341 = vmatpush.bf16.msra.mxu3 %v1127_v5  ;;  %v1124_v5 = vld [vmem:[#allocation4 + $0xf8] sm:$0xff] }
  0x26   :  { %387 = vmatpush.bf16.msra.mxu0 %v1126_v6  ;;  %1342 = vmatpush.bf16.msra.mxu1 %v1126_v6 }
  0x27   :  { %1343 = vmatpush.bf16.msra.mxu2 %v1126_v6  ;;  %1344 = vmatpush.bf16.msra.mxu3 %v1126_v6 }
  0x2a   :  { %388 = vmatpush.bf16.msra.mxu0 %v1125_v7  ;;  %1345 = vmatpush.bf16.msra.mxu1 %v1125_v7 }
  0x2b   :  { %1346 = vmatpush.bf16.msra.mxu2 %v1125_v7  ;;  %1347 = vmatpush.bf16.msra.mxu3 %v1125_v7 }
  0x2d   :  { %389 = vmatmul.bf16.vlgmr.msra.gmra.mxu0 %v1093_v8  ;;  %429 = vmatmul.bf16.vlgmr.msra.gmra.mxu1 %v1101_v9 }
  0x2e   :  { %469 = vmatmul.bf16.vlgmr.msra.gmra.mxu2 %v1109_v12  ;;  %509 = vmatmul.bf16.vlgmr.msra.gmra.mxu3 %v1117_v19 }
  0x3d   :  { %394 = vmatmul.bf16.gmra.mxu0 %v1094_v10  ;;  %434 = vmatmul.bf16.gmra.mxu1 %v1102_v11 }
  0x3e   :  { %474 = vmatmul.bf16.gmra.mxu2 %v1110_v15  ;;  %514 = vmatmul.bf16.gmra.mxu3 %v1118_v23 }
  0x4d   :  { %399 = vmatmul.bf16.gmra.mxu0 %v1095_v13  ;;  %439 = vmatmul.bf16.gmra.mxu1 %v1103_v14 }
  0x4e   :  { %479 = vmatmul.bf16.gmra.mxu2 %v1111_v18  ;;  %519 = vmatmul.bf16.gmra.mxu3 %v1119_v27 }
  0x5d   :  { %404 = vmatmul.bf16.gmra.mxu0 %v1096_v16  ;;  %444 = vmatmul.bf16.gmra.mxu1 %v1104_v17 }
  0x5e   :  { %484 = vmatmul.bf16.gmra.mxu2 %v1112_v22  ;;  %524 = vmatmul.bf16.gmra.mxu3 %v1120_v31 }
  0x6d   :  { %409 = vmatmul.bf16.gmra.mxu0 %v1097_v20  ;;  %449 = vmatmul.bf16.gmra.mxu1 %v1105_v21 }
  0x6e   :  { %489 = vmatmul.bf16.gmra.mxu2 %v1113_v26  ;;  %529 = vmatmul.bf16.gmra.mxu3 %v1121_v35 }
  0x7d   :  { %414 = vmatmul.bf16.gmra.mxu0 %v1098_v24  ;;  %454 = vmatmul.bf16.gmra.mxu1 %v1106_v25 }
  0x7e   :  { %494 = vmatmul.bf16.gmra.mxu2 %v1114_v30  ;;  %534 = vmatmul.bf16.gmra.mxu3 %v1122_v39 }
  0x8d   :  { %419 = vmatmul.bf16.gmra.mxu0 %v1099_v28  ;;  %459 = vmatmul.bf16.gmra.mxu1 %v1107_v29 }
  0x8e   :  { %499 = vmatmul.bf16.gmra.mxu2 %v1115_v34  ;;  %539 = vmatmul.bf16.gmra.mxu3 %v1123_v53 }
  0x9d   :  { %424 = vmatmul.bf16.gmra.mxu0 %v1100_v32  ;;  %464 = vmatmul.bf16.gmra.mxu1 %v1108_v33 }
  0x9e   :  { %504 = vmatmul.bf16.gmra.mxu2 %v1116_v38  ;;  %544 = vmatmul.bf16.gmra.mxu3 %v1124_v5 }
  0xaa   :  { %v390_v36 = vpop.f32.mrf.mxu0  ;;  %v1498_v37 = vpop.f32.mrf.mxu1 }
  0xab   :  { %v751_v40 = vmul.f32 %v390_v36, %v390_v36 }
  0xb1   :  { %v1510_v60 = vpop.f32.mrf.mxu2  ;;  %v1540_v20 = vpop.f32.mrf.mxu3 }
  0xb2   :  { %v392_v41 = vpop.f32.mrf.mxu0  ;;  %v1500_v42 = vpop.f32.mrf.mxu1 }
  0xb3   :  { %v1136_v43 = vpack.c.bf16 %v392_v41, %v390_v36  ;;  %v679_v44 = vadd.f32 %v392_v41, %v390_v36  ;;  %v752_v45 = vmul.f32 %v392_v41, %v392_v41  ;;  %v1176_v46 = vpack.c.bf16 %v1500_v42, %v1498_v37 }
  0xb5   :  { %1137 = vst [vmem:[#allocation9] sm:$0xff] %v1136_v43   ;;  %v815_v47 = vadd.f32 %v752_v45, %v751_v40 }
  0xb6   :  { %1300 = vst [vmem:[#allocation9 + $0x40] sm:$0xff] %v1176_v46  }
  0xb9   :  { %v1516_v2 = vpop.f32.mrf.mxu2  ;;  %v1546_v24 = vpop.f32.mrf.mxu3 }
  0xba   :  { %v395_v48 = vpop.f32.mrf.mxu0  ;;  %v1504_v49 = vpop.f32.mrf.mxu1  ;;  %v1216_v3 = vpack.c.bf16 %v1516_v2, %v1510_v60  ;;  %v1256_v26 = vpack.c.bf16 %v1546_v24, %v1540_v20 }
  0xbb   :  { %v680_v50 = vadd.f32 %v679_v44, %v395_v48  ;;  %v753_v51 = vmul.f32 %v395_v48, %v395_v48 }
  0xbc   :  { %1308 = vst [vmem:[#allocation9 + $0x80] sm:$0xff] %v1216_v3  }
  0xbd   :  { %v816_v52 = vadd.f32 %v815_v47, %v753_v51  ;;  %1316 = vst [vmem:[#allocation9 + $0xc0] sm:$0xff] %v1256_v26  }
  0xc1   :  { %v1526_v10 = vpop.f32.mrf.mxu2  ;;  %v1558_v32 = vpop.f32.mrf.mxu3 }
  0xc2   :  { %v397_v54 = vpop.f32.mrf.mxu0  ;;  %v1506_v55 = vpop.f32.mrf.mxu1 }
  0xc3   :  { %v1141_v56 = vpack.c.bf16 %v397_v54, %v395_v48  ;;  %v681_v57 = vadd.f32 %v680_v50, %v397_v54  ;;  %v754_v58 = vmul.f32 %v397_v54, %v397_v54  ;;  %v1181_v59 = vpack.c.bf16 %v1506_v55, %v1504_v49 }
  0xc5   :  { %1293 = vst [vmem:[#allocation9 + $0x8] sm:$0xff] %v1141_v56   ;;  %v817_v61 = vadd.f32 %v816_v52, %v754_v58 }
  0xc6   :  { %1301 = vst [vmem:[#allocation9 + $0x48] sm:$0xff] %v1181_v59  }
  0xc9   :  { %v1530_v13 = vpop.f32.mrf.mxu2  ;;  %v1564_v36 = vpop.f32.mrf.mxu3 }
  0xca   :  { %v400_v62 = vpop.f32.mrf.mxu0  ;;  %v1512_v63 = vpop.f32.mrf.mxu1  ;;  %v1221_v14 = vpack.c.bf16 %v1530_v13, %v1526_v10  ;;  %v1261_v39 = vpack.c.bf16 %v1564_v36, %v1558_v32 }
  0xcb   :  { %v1514_v0 = vadd.f32 %v681_v57, %v400_v62  ;;  %v755_v1 = vmul.f32 %v400_v62, %v400_v62 }
  0xcc   :  { %1309 = vst [vmem:[#allocation9 + $0x88] sm:$0xff] %v1221_v14  }
  0xcd   :  { %v1520_v4 = vadd.f32 %v817_v61, %v755_v1  ;;  %1317 = vst [vmem:[#allocation9 + $0xc8] sm:$0xff] %v1261_v39  }
  0xd1   :  { %v1538_v19 = vpop.f32.mrf.mxu2  ;;  %v1576_v46 = vpop.f32.mrf.mxu3 }
  0xd2   :  { %v402_v6 = vpop.f32.mrf.mxu0  ;;  %v1522_v7 = vpop.f32.mrf.mxu1 }
  0xd3   :  { %v1146_v8 = vpack.c.bf16 %v402_v6, %v400_v62  ;;  %v1186_v9 = vpack.c.bf16 %v1522_v7, %v1512_v63  ;;  %v756_v52 = vmul.f32 %v402_v6, %v402_v6  ;;  %v683_v57 = vadd.f32 %v1514_v0, %v402_v6 }
  0xd5   :  { %1294 = vst [vmem:[#allocation9 + $0x10] sm:$0xff] %v1146_v8   ;;  %v819_v58 = vadd.f32 %v1520_v4, %v756_v52 }
  0xd6   :  { %1302 = vst [vmem:[#allocation9 + $0x50] sm:$0xff] %v1186_v9  }
  0xd9   :  { %v1544_v23 = vpop.f32.mrf.mxu2  ;;  %v1582_v51 = vpop.f32.mrf.mxu3 }
  0xda   :  { %v405_v11 = vpop.f32.mrf.mxu0  ;;  %v1528_v12 = vpop.f32.mrf.mxu1  ;;  %v1226_v25 = vpack.c.bf16 %v1544_v23, %v1538_v19  ;;  %v1266_v54 = vpack.c.bf16 %v1582_v51, %v1576_v46 }
  0xdb   :  { %v757_v56 = vmul.f32 %v405_v11, %v405_v11  ;;  %v684_v61 = vadd.f32 %v683_v57, %v405_v11 }
  0xdc   :  { %1310 = vst [vmem:[#allocation9 + $0x90] sm:$0xff] %v1226_v25  }
  0xdd   :  { %1318 = vst [vmem:[#allocation9 + $0xd0] sm:$0xff] %v1266_v54   ;;  %v820_v62 = vadd.f32 %v819_v58, %v757_v56 }
  0xe1   :  { %v1556_v31 = vpop.f32.mrf.mxu2 }
  0xe2   :  { %v407_v15 = vpop.f32.mrf.mxu0  ;;  %v1534_v16 = vpop.f32.mrf.mxu1 }
  0xe3   :  { %v1151_v17 = vpack.c.bf16 %v407_v15, %v405_v11  ;;  %v1191_v18 = vpack.c.bf16 %v1534_v16, %v1528_v12  ;;  %v758_v59 = vmul.f32 %v407_v15, %v407_v15  ;;  %v685_v8 = vadd.f32 %v684_v61, %v407_v15 }
  0xe5   :  { %1295 = vst [vmem:[#allocation9 + $0x18] sm:$0xff] %v1151_v17   ;;  %v821_v0 = vadd.f32 %v820_v62, %v758_v59 }
  0xe6   :  { %1303 = vst [vmem:[#allocation9 + $0x58] sm:$0xff] %v1191_v18   ;;  %v1596_v18 = vpop.f32.mrf.mxu3 }
  0xe9   :  { %v1562_v35 = vpop.f32.mrf.mxu2 }
  0xea   :  { %v410_v21 = vpop.f32.mrf.mxu0  ;;  %v1542_v22 = vpop.f32.mrf.mxu1  ;;  %v1231_v38 = vpack.c.bf16 %v1562_v35, %v1556_v31 }
  0xeb   :  { %v759_v1 = vmul.f32 %v410_v21, %v410_v21  ;;  %v686_v25 = vadd.f32 %v685_v8, %v410_v21 }
  0xec   :  { %1311 = vst [vmem:[#allocation9 + $0x98] sm:$0xff] %v1231_v38  }
  0xed   :  { %v822_v4 = vadd.f32 %v821_v0, %v759_v1 }
  0xee   :  { %v1602_v54 = vpop.f32.mrf.mxu3 }
  0xf1   :  { %v1574_v45 = vpop.f32.mrf.mxu2 }
  0xf2   :  { %v412_v27 = vpop.f32.mrf.mxu0  ;;  %v1552_v28 = vpop.f32.mrf.mxu1 }
  0xf3   :  { %v1156_v29 = vpack.c.bf16 %v412_v27, %v410_v21  ;;  %v1196_v30 = vpack.c.bf16 %v1552_v28, %v1542_v22  ;;  %v760_v6 = vmul.f32 %v412_v27, %v412_v27  ;;  %v687_v26 = vadd.f32 %v686_v25, %v412_v27 }
  0xf4   :  { %v1271_v27 = vpack.c.bf16 %v1602_v54, %v1596_v18 }
  0xf5   :  { %1296 = vst [vmem:[#allocation9 + $0x20] sm:$0xff] %v1156_v29   ;;  %v823_v29 = vadd.f32 %v822_v4, %v760_v6 }
  0xf6   :  { %1304 = vst [vmem:[#allocation9 + $0x60] sm:$0xff] %v1196_v30  }
  0xf7   :  { %1319 = vst [vmem:[#allocation9 + $0xd8] sm:$0xff] %v1271_v27  }
  0xf9   :  { %v1580_v50 = vpop.f32.mrf.mxu2 }
  0xfa   :  { %v415_v33 = vpop.f32.mrf.mxu0  ;;  %v1560_v34 = vpop.f32.mrf.mxu1  ;;  %v1236_v53 = vpack.c.bf16 %v1580_v50, %v1574_v45 }
  0xfb   :  { %v761_v11 = vmul.f32 %v415_v33, %v415_v33  ;;  %v688_v38 = vadd.f32 %v687_v26, %v415_v33 }
  0xfc   :  { %1312 = vst [vmem:[#allocation9 + $0xa0] sm:$0xff] %v1236_v53  }
  0xfd   :  { %v824_v15 = vadd.f32 %v823_v29, %v761_v11  ;;  %v768_v29 = vmul.f32 %v1500_v42, %v1500_v42 }
 0x101   :  { %v1594_v17 = vpop.f32.mrf.mxu2 }
 0x102   :  { %v417_v40 = vpop.f32.mrf.mxu0  ;;  %v1570_v41 = vpop.f32.mrf.mxu1 }
 0x103   :  { %v1161_v43 = vpack.c.bf16 %v417_v40, %v415_v33  ;;  %v1201_v44 = vpack.c.bf16 %v1570_v41, %v1560_v34  ;;  %v762_v30 = vmul.f32 %v417_v40, %v417_v40  ;;  %v689_v52 = vadd.f32 %v688_v38, %v417_v40 }
 0x105   :  { %1297 = vst [vmem:[#allocation9 + $0x28] sm:$0xff] %v1161_v43   ;;  %v825_v56 = vadd.f32 %v824_v15, %v762_v30  ;;  %v769_v15 = vmul.f32 %v1504_v49, %v1504_v49 }
 0x106   :  { %1305 = vst [vmem:[#allocation9 + $0x68] sm:$0xff] %v1201_v44  }
 0x109   :  { %v1600_v53 = vpop.f32.mrf.mxu2 }
 0x10a   :  { %v420_v47 = vpop.f32.mrf.mxu0  ;;  %v1578_v48 = vpop.f32.mrf.mxu1  ;;  %v1241_v57 = vpack.c.bf16 %v1600_v53, %v1594_v17 }
 0x10b   :  { %v763_v39 = vmul.f32 %v420_v47, %v420_v47  ;;  %v690_v58 = vadd.f32 %v689_v52, %v420_v47  ;;  %v770_v52 = vmul.f32 %v1506_v55, %v1506_v55 }
 0x10c   :  { %1313 = vst [vmem:[#allocation9 + $0xa8] sm:$0xff] %v1241_v57  }
 0x10d   :  { %v826_v33 = vadd.f32 %v825_v56, %v763_v39 }
 0x111   :  { %v1612_v4 = vpop.f32.mrf.mxu2 }
 0x112   :  { %v422_v3 = vpop.f32.mrf.mxu0  ;;  %v1590_v5 = vpop.f32.mrf.mxu1 }
 0x113   :  { %v1166_v9 = vpack.c.bf16 %v422_v3, %v420_v47  ;;  %v1206_v14 = vpack.c.bf16 %v1590_v5, %v1578_v48  ;;  %v764_v21 = vmul.f32 %v422_v3, %v422_v3  ;;  %v691_v61 = vadd.f32 %v690_v58, %v422_v3  ;;  %v1614_v47 = vpop.f32.mrf.mxu3 }
 0x114   :  { %v767_v3 = vmul.f32 %v1498_v37, %v1498_v37 }
 0x115   :  { %1298 = vst [vmem:[#allocation9 + $0x30] sm:$0xff] %v1166_v9   ;;  %v827_v62 = vadd.f32 %v826_v33, %v764_v21 }
 0x116   :  { %1306 = vst [vmem:[#allocation9 + $0x70] sm:$0xff] %v1206_v14  }
 0x119   :  { %v1628_v21 = vpop.f32.mrf.mxu2 }
 0x11a   :  { %v425_v43 = vpop.f32.mrf.mxu0  ;;  %v1598_v44 = vpop.f32.mrf.mxu1 }
 0x11b   :  { %v765_v59 = vmul.f32 %v425_v43, %v425_v43  ;;  %v692_v40 = vadd.f32 %v691_v61, %v425_v43  ;;  %v1630_v57 = vpop.f32.mrf.mxu3 }
 0x11c   :  { %v1276_v27 = vpack.c.bf16 %v1630_v57, %v1614_v47 }
 0x11d   :  { %v828_v1 = vadd.f32 %v827_v62, %v765_v59  ;;  %v773_v62 = vmul.f32 %v1528_v12, %v1528_v12 }
 0x11e   :  { %1320 = vst [vmem:[#allocation9 + $0xe0] sm:$0xff] %v1276_v27   ;;  %v780_v27 = vmul.f32 %v1590_v5, %v1590_v5 }
 0x122   :  { %v427_v8 = vpop.f32.mrf.mxu0  ;;  %v1608_v9 = vpop.f32.mrf.mxu1 }
 0x123   :  { %v1171_v14 = vpack.c.bf16 %v427_v8, %v425_v43  ;;  %v693_v0 = vadd.f32 %v692_v40, %v427_v8  ;;  %v766_v6 = vmul.f32 %v427_v8, %v427_v8  ;;  %v1211_v25 = vpack.c.bf16 %v1608_v9, %v1598_v44 }
 0x124   :  { %v774_v8 = vmul.f32 %v1534_v16, %v1534_v16 }
 0x125   :  { %1299 = vst [vmem:[#allocation9 + $0x38] sm:$0xff] %v1171_v14   ;;  %v694_v11 = vadd.f32 %v693_v0, %v1498_v37  ;;  %v829_v26 = vadd.f32 %v828_v1, %v766_v6  ;;  %v1648_v0 = vpop.f32.mrf.mxu2  ;;  %v1650_v6 = vpop.f32.mrf.mxu3 }
 0x126   :  { %1307 = vst [vmem:[#allocation9 + $0x78] sm:$0xff] %v1211_v25  }
 0x127   :  { %v695_v30 = vadd.f32 %v694_v11, %v1500_v42  ;;  %v830_v38 = vadd.f32 %v829_v26, %v767_v3  ;;  %v1246_v42 = vpack.c.bf16 %v1628_v21, %v1612_v4  ;;  %v776_v11 = vmul.f32 %v1552_v28, %v1552_v28 }
 0x129   :  { %v696_v39 = vadd.f32 %v695_v30, %v1504_v49  ;;  %v831_v43 = vadd.f32 %v830_v38, %v768_v29  ;;  %v771_v49 = vmul.f32 %v1512_v63, %v1512_v63  ;;  %1314 = vst [vmem:[#allocation9 + $0xb0] sm:$0xff] %v1246_v42   ;;  %v778_v38 = vmul.f32 %v1570_v41, %v1570_v41 }
 0x12b   :  { %v697_v56 = vadd.f32 %v696_v39, %v1506_v55  ;;  %v832_v37 = vadd.f32 %v831_v43, %v769_v15  ;;  %v772_v55 = vmul.f32 %v1522_v7, %v1522_v7 }
 0x12d   :  { %v698_v58 = vadd.f32 %v697_v56, %v1512_v63  ;;  %v833_v33 = vadd.f32 %v832_v37, %v770_v52  ;;  %v1666_v43 = vpop.f32.mrf.mxu3 }
 0x12e   :  { %v1281_v52 = vpack.c.bf16 %v1666_v43, %v1650_v6 }
 0x12f   :  { %v699_v59 = vadd.f32 %v698_v58, %v1522_v7  ;;  %v834_v61 = vadd.f32 %v833_v33, %v771_v49  ;;  %v775_v7 = vmul.f32 %v1542_v22, %v1542_v22  ;;  %v781_v33 = vmul.f32 %v1598_v44, %v1598_v44 }
 0x130   :  { %1321 = vst [vmem:[#allocation9 + $0xe8] sm:$0xff] %v1281_v52   ;;  %v791_v52 = vmul.f32 %v1574_v45, %v1574_v45 }
 0x131   :  { %v835_v40 = vadd.f32 %v834_v61, %v772_v55  ;;  %v700_v1 = vadd.f32 %v699_v59, %v1528_v12 }
 0x133   :  { %v701_v63 = vadd.f32 %v700_v1, %v1534_v16  ;;  %v836_v14 = vadd.f32 %v835_v40, %v773_v62  ;;  %v777_v16 = vmul.f32 %v1560_v34, %v1560_v34  ;;  %v783_v62 = vmul.f32 %v1510_v60, %v1510_v60 }
 0x134   :  { %v784_v1 = vmul.f32 %v1516_v2, %v1516_v2 }
 0x135   :  { %v702_v25 = vadd.f32 %v701_v63, %v1542_v22  ;;  %v837_v3 = vadd.f32 %v836_v14, %v774_v8  ;;  %v1664_v22 = vpop.f32.mrf.mxu2  ;;  %v1684_v61 = vpop.f32.mrf.mxu3  ;;  %v785_v63 = vmul.f32 %v1526_v10, %v1526_v10 }
 0x137   :  { %v703_v12 = vadd.f32 %v702_v25, %v1552_v28  ;;  %v838_v26 = vadd.f32 %v837_v3, %v775_v7  ;;  %v1251_v28 = vpack.c.bf16 %v1664_v22, %v1648_v0  ;;  %v786_v7 = vmul.f32 %v1530_v13, %v1530_v13 }
 0x139   :  { %v704_v29 = vadd.f32 %v703_v12, %v1560_v34  ;;  %v839_v30 = vadd.f32 %v838_v26, %v776_v11  ;;  %v779_v34 = vmul.f32 %v1578_v48, %v1578_v48  ;;  %1315 = vst [vmem:[#allocation9 + $0xb8] sm:$0xff] %v1251_v28  }
 0x13b   :  { %v705_v15 = vadd.f32 %v704_v29, %v1570_v41  ;;  %v840_v39 = vadd.f32 %v839_v30, %v777_v16 }
 0x13d   :  { %v706_v56 = vadd.f32 %v705_v15, %v1578_v48  ;;  %v841_v37 = vadd.f32 %v840_v39, %v778_v38  ;;  %v782_v48 = vmul.f32 %v1608_v9, %v1608_v9  ;;  %v790_v15 = vmul.f32 %v1562_v35, %v1562_v35 }
 0x13f   :  { %v842_v42 = vadd.f32 %v841_v37, %v779_v34  ;;  %v707_v41 = vadd.f32 %v706_v56, %v1590_v5  ;;  %v792_v34 = vmul.f32 %v1580_v50, %v1580_v50 }
 0x141   :  { %v843_v49 = vadd.f32 %v842_v42, %v780_v27  ;;  %v708_v58 = vadd.f32 %v707_v41, %v1598_v44  ;;  %v793_v42 = vmul.f32 %v1594_v17, %v1594_v17  ;;  %v794_v27 = vmul.f32 %v1600_v53, %v1600_v53 }
 0x143   :  { %v844_v55 = vadd.f32 %v843_v49, %v781_v33  ;;  %v709_v59 = vadd.f32 %v708_v58, %v1608_v9 }
 0x145   :  { %v710_v5 = vadd.f32 %v709_v59, %v1510_v60  ;;  %v845_v40 = vadd.f32 %v844_v55, %v782_v48  ;;  %v1698_v60 = vpop.f32.mrf.mxu3  ;;  %v795_v55 = vmul.f32 %v1612_v4, %v1612_v4 }
 0x146   :  { %v1286_v11 = vpack.c.bf16 %v1698_v60, %v1684_v61 }
 0x147   :  { %v711_v8 = vadd.f32 %v710_v5, %v1516_v2  ;;  %v846_v44 = vadd.f32 %v845_v40, %v783_v62  ;;  %v787_v2 = vmul.f32 %v1538_v19, %v1538_v19  ;;  %v797_v40 = vmul.f32 %v1648_v0, %v1648_v0 }
 0x148   :  { %1322 = vst [vmem:[#allocation9 + $0xf0] sm:$0xff] %v1286_v11   ;;  %v802_v11 = vmul.f32 %v1564_v36, %v1564_v36 }
 0x149   :  { %v712_v14 = vadd.f32 %v711_v8, %v1526_v10  ;;  %v847_v9 = vadd.f32 %v846_v44, %v784_v1  ;;  %v788_v10 = vmul.f32 %v1544_v23, %v1544_v23  ;;  %v798_v8 = vmul.f32 %v1664_v22, %v1664_v22 }
 0x14a   :  { %v1464_v44 = vmov 0.0  }
 0x14b   :  { %v713_v25 = vadd.f32 %v712_v14, %v1530_v13  ;;  %v848_v3 = vadd.f32 %v847_v9, %v785_v63  ;;  %v789_v13 = vmul.f32 %v1556_v31, %v1556_v31  ;;  %59 = vst [vmem:[#allocation2] sm:$0x1] %v1464_v44  ;;  %v800_v9 = vmul.f32 %v1546_v24, %v1546_v24 }
 0x14c   :  { %60 = vst [vmem:[#allocation3] sm:$0x1] %v1464_v44 }
 0x14d   :  { %v714_v12 = vadd.f32 %v713_v25, %v1538_v19  ;;  %v849_v26 = vadd.f32 %v848_v3, %v786_v7  ;;  %v1714_v28 = vpop.f32.mrf.mxu3  ;;  %v801_v25 = vmul.f32 %v1558_v32, %v1558_v32 }
 0x14f   :  { %v715_v16 = vadd.f32 %v714_v12, %v1544_v23  ;;  %v850_v29 = vadd.f32 %v849_v26, %v787_v2  ;;  %v803_v12 = vmul.f32 %v1576_v46, %v1576_v46 }
 0x151   :  { %v851_v30 = vadd.f32 %v850_v29, %v788_v10  ;;  %v716_v38 = vadd.f32 %v715_v16, %v1556_v31 }
 0x153   :  { %v717_v39 = vadd.f32 %v716_v38, %v1562_v35  ;;  %v852_v19 = vadd.f32 %v851_v30, %v789_v13 }
 0x155   :  { %v718_v23 = vadd.f32 %v717_v39, %v1574_v45  ;;  %v853_v56 = vadd.f32 %v852_v19, %v790_v15 }
 0x157   :  { %v719_v37 = vadd.f32 %v718_v23, %v1580_v50  ;;  %v854_v31 = vadd.f32 %v853_v56, %v791_v52  ;;  %v1731_v50 = vpop.f32.mrf.mxu3 }
 0x158   :  { %v1291_v58 = vpack.c.bf16 %v1731_v50, %v1714_v28 }
 0x159   :  { %v720_v35 = vadd.f32 %v719_v37, %v1594_v17  ;;  %v855_v41 = vadd.f32 %v854_v31, %v792_v34  ;;  %v810_v37 = vmul.f32 %v1666_v43, %v1666_v43 }
 0x15a   :  { %1323 = vst [vmem:[#allocation9 + $0xf8] sm:$0xff] %v1291_v58  }
 0x15b   :  { %v721_v45 = vadd.f32 %v720_v35, %v1600_v53  ;;  %v856_v49 = vadd.f32 %v855_v41, %v793_v42  ;;  %v796_v53 = vmul.f32 %v1628_v21, %v1628_v21  ;;  %909 = dma.vmem_to_hbm [thread:$0]  %s902_s1, 4096, %s904_s26, [#allocation6], %s1460_s20, %s1460_s20, %s1461_s21   ;;  %v811_v35 = vmul.f32 %v1684_v61, %v1684_v61 }
 0x15d   :  { %v857_v17 = vadd.f32 %v856_v49, %v794_v27  ;;  %v722_v33 = vadd.f32 %v721_v45, %v1612_v4  ;;  %v812_v45 = vmul.f32 %v1698_v60, %v1698_v60  ;;  %v813_v49 = vmul.f32 %v1714_v28, %v1714_v28 }
 0x15f   :  { %v858_v59 = vadd.f32 %v857_v17, %v795_v55  ;;  %v723_v48 = vadd.f32 %v722_v33, %v1628_v21  ;;  %v799_v21 = vmul.f32 %v1540_v20, %v1540_v20  ;;  %v814_v17 = vmul.f32 %v1731_v50, %v1731_v50 }
 0x161   :  { %v859_v62 = vadd.f32 %v858_v59, %v796_v53  ;;  %v724_v5 = vadd.f32 %v723_v48, %v1648_v0 }
 0x163   :  { %v860_v1 = vadd.f32 %v859_v62, %v797_v40  ;;  %v725_v4 = vadd.f32 %v724_v5, %v1664_v22 }
 0x165   :  { %v726_v63 = vadd.f32 %v725_v4, %v1540_v20  ;;  %v861_v14 = vadd.f32 %v860_v1, %v798_v8  ;;  %v678_v1 = vld [vmem:[#allocation2] sm:$0x1] }
 0x167   :  { %v727_v0 = vadd.f32 %v726_v63, %v1546_v24  ;;  %v862_v7 = vadd.f32 %v861_v14, %v799_v21  ;;  %v804_v24 = vmul.f32 %v1582_v51, %v1582_v51 }
 0x169   :  { %v728_v22 = vadd.f32 %v727_v0, %v1558_v32  ;;  %v863_v3 = vadd.f32 %v862_v7, %v800_v9  ;;  %v805_v32 = vmul.f32 %v1596_v18, %v1596_v18 }
 0x16b   :  { %v729_v2 = vadd.f32 %v728_v22, %v1564_v36  ;;  %v864_v20 = vadd.f32 %v863_v3, %v801_v25  ;;  %v806_v36 = vmul.f32 %v1602_v54, %v1602_v54 }
 0x16d   :  { %v730_v26 = vadd.f32 %v729_v2, %v1576_v46  ;;  %v865_v10 = vadd.f32 %v864_v20, %v802_v11  ;;  %v807_v46 = vmul.f32 %v1614_v47, %v1614_v47 }
 0x16f   :  { %v731_v16 = vadd.f32 %v730_v26, %v1582_v51  ;;  %v866_v29 = vadd.f32 %v865_v10, %v803_v12  ;;  %v808_v51 = vmul.f32 %v1630_v57, %v1630_v57 }
 0x171   :  { %v867_v13 = vadd.f32 %v866_v29, %v804_v24  ;;  %v732_v30 = vadd.f32 %v731_v16, %v1596_v18  ;;  %v809_v18 = vmul.f32 %v1650_v6, %v1650_v6 }
 0x173   :  { %v733_v38 = vadd.f32 %v732_v30, %v1602_v54  ;;  %v868_v15 = vadd.f32 %v867_v13, %v805_v32 }
 0x175   :  { %v734_v39 = vadd.f32 %v733_v38, %v1614_v47  ;;  %v869_v19 = vadd.f32 %v868_v15, %v806_v36 }
 0x177   :  { %v735_v52 = vadd.f32 %v734_v39, %v1630_v57  ;;  %v870_v23 = vadd.f32 %v869_v19, %v807_v46 }
 0x179   :  { %v736_v56 = vadd.f32 %v735_v52, %v1650_v6  ;;  %v871_v34 = vadd.f32 %v870_v23, %v808_v51 }
 0x17b   :  { %v737_v54 = vadd.f32 %v736_v56, %v1666_v43  ;;  %v872_v31 = vadd.f32 %v871_v34, %v809_v18 }
 0x17d   :  { %v873_v47 = vadd.f32 %v872_v31, %v810_v37  ;;  %v738_v42 = vadd.f32 %v737_v54, %v1684_v61 }
 0x17f   :  { %v874_v57 = vadd.f32 %v873_v47, %v811_v35  ;;  %v739_v41 = vadd.f32 %v738_v42, %v1698_v60 }
 0x181   :  { %v875_v6 = vadd.f32 %v874_v57, %v812_v45  ;;  %v740_v27 = vadd.f32 %v739_v41, %v1714_v28  ;;  %v750_v28 = vld [vmem:[#allocation3] sm:$0x1] }
 0x183   :  { %v876_v43 = vadd.f32 %v875_v6, %v813_v49  ;;  %v741_v58 = vadd.f32 %v740_v27, %v1731_v50 }
 0x185   :  { %v742_v33 = vrot.slane %v741_v58, 4  ;;  %v877_v61 = vadd.f32 %v876_v43, %v814_v17 }
 0x187   :  { %v743_v55 = vadd.f32 %v742_v33, %v741_v58  ;;  %v878_v59 = vrot.slane %v877_v61, 4 }
 0x189   :  { %v744_v48 = vrot.slane %v743_v55, 2  ;;  %v879_v53 = vadd.f32 %v878_v59, %v877_v61 }
 0x18b   :  { %v745_v62 = vadd.f32 %v744_v48, %v743_v55  ;;  %v880_v60 = vrot.slane %v879_v53, 2 }
 0x18d   :  { %v746_v5 = vrot.slane %v745_v62, 1  ;;  %v881_v40 = vadd.f32 %v880_v60, %v879_v53 }
 0x18f   :  { %v747_v4 = vadd.f32 %v746_v5, %v745_v62  ;;  %v882_v8 = vrot.slane %v881_v40, 1 }
 0x191   :  { %v748_v44 = vadd.f32 %v747_v4, %v678_v1  ;;  %v883_v21 = vadd.f32 %v882_v8, %v881_v40 }
 0x193   :  { %749 = vst [vmem:[#allocation2] sm:$0x1] %v748_v44  ;;  %v884_v63 = vadd.f32 %v883_v21, %v750_v28 }
 0x195   :  { %885 = vst [vmem:[#allocation3] sm:$0x1] %v884_v63 }
 0x19a   :  { %v889_v50 = vld [vmem:[#allocation2] sm:$0x1] }
 0x19b   :  { %890 = vst [vmem:[#allocation10] sm:$0x1] %v889_v50 }
 0x19c   :  { %v891_v14 = vld [vmem:[#allocation3] sm:$0x1] }
 0x19d   :  { %892 = vst [vmem:[#allocation10 + $0x1] sm:$0x1] %v891_v14 }
 0x19e   :  { %920 = dma.vmem_to_hbm [thread:$0]  %s916_s27, 32, %s918_s30, [#allocation11]  }
 0x19f   :  { %1455 = dma.done.wait [#allocation6], 4096  }
 0x1a0   :  { %1456 = vsyncadd [#allocation6], 4294963200 }
 0x1a1   :  { %1457 = dma.done.wait [#allocation11], 32  }
 0x1a2   :  { %1458 = vsyncadd [#allocation11], 4294967264 }
 0x1a3   :  { %929 = vsyncpa [#allocation5], 1 }
 0x1a4   :  { %930 = vsyncpa [#allocation8], 1 }
 0x1a5   :  { %931 = vsyncpa [#allocation6], 1 }
 0x1a6   :  { %932 = vsyncpa [#allocation11], 1 }

</bundles_post_ra>
